<compile_context>
chip_gen: v7x
topology: tpu7x:2x2x1
jax: 0.10.0
libtpu: 0.0.40
codegen_flags: <defaults>
</compile_context>

<pallas_src>
import functools

import jax
import jax.numpy as jnp
from jax.experimental import pallas as pl
from jax.experimental.pallas import tpu as pltpu

# Layer dims, matching the PyTorch module:
# fc1: 62->62, fc2: 62->52, fc3: 52->52, fc4: 52->52, fc5: 52->42,
# fc6: 42->42, fc7: 42->32, fc8: 32->32, fc9: 32->32
LAYER_DIMS = [(62, 62), (62, 52), (52, 52), (52, 52), (52, 42),
              (42, 42), (42, 32), (32, 32), (32, 32)]
# Activation per layer (fc5 uses ReLU, fc9 is linear, rest GELU).
ACTS = ["gelu", "gelu", "gelu", "gelu", "relu", "gelu", "gelu", "gelu", "none"]

N_LAYERS = len(LAYER_DIMS)
PAD = 128                              # uniform lane width for the middle layers
IN_FEATURES = LAYER_DIMS[0][0]         # 62
OUT_FEATURES = LAYER_DIMS[-1][1]       # 32
N_MID = N_LAYERS - 2                   # 7 uniform 128x128 layers (fc2..fc8)
N_GELU = sum(1 for a in ACTS if a == "gelu")


def _round_up(n, m):
    return ((n + m - 1) // m) * m


def mlp_kernel(x_ref, w1_ref, wmid_ref, wlast_ref, bmain_ref, blast_ref, o_ref):
    # x_ref:     (bb, 62)        activations for this batch tile
    # w1_ref:    (62, 128)       fc1 weight (in, out), zero-padded out-cols
    # wmid_ref:  (7, 128, 128)   fc2..fc8 weights, zero-padded, (in, out)
    # wlast_ref: (128, 32)       fc9 weight, zero-padded in-rows
    # bmain_ref: (8, 1, 128)     fc1..fc8 biases, zero-padded
    # blast_ref: (1, 32)         fc9 bias
    # o_ref:     (bb, 32)        exact-width output tile

    # fc1: contract K=62 directly (Mosaic zero-masks the unaligned K dim).
    h = jnp.dot(x_ref[...], w1_ref[...],
                preferred_element_type=jnp.float32) + bmain_ref[0]
    h = jax.nn.gelu(h, approximate=True)       # tanh GELU -> EUP slot

    # fc2..fc8: uniform (bb,128)@(128,128) MXU matmuls.  Static Python unroll
    # on purpose so the LLO scheduler can interleave MXU/VPU/EUP work.
    for li in range(1, N_LAYERS - 1):
        h = jnp.dot(h, wmid_ref[li - 1],
                    preferred_element_type=jnp.float32) + bmain_ref[li]
        if ACTS[li] == "gelu":
            h = jax.nn.gelu(h, approximate=True)
        else:                                  # fc5: ReLU
            h = jnp.maximum(h, 0.0)

    # fc9 (linear): (bb,128)@(128,32) -> exact (bb,32), stored directly.
    o_ref[...] = (jnp.dot(h, wlast_ref[...], preferred_element_type=jnp.float32)
                  + blast_ref[...]).astype(o_ref.dtype)


def init_params(key):
    """Deterministic init mirroring PyTorch nn.Linear defaults:
    U(-1/sqrt(fan_in), 1/sqrt(fan_in)) for both weights and biases.
    Weights are stored already transposed: (in, out)."""
    params = []
    for (fan_in, fan_out) in LAYER_DIMS:
        key, kw, kb = jax.random.split(key, 3)
        bound = 1.0 / jnp.sqrt(jnp.float32(fan_in))
        w = jax.random.uniform(kw, (fan_in, fan_out), jnp.float32, -bound, bound)
        b = jax.random.uniform(kb, (fan_out,), jnp.float32, -bound, bound)
        params.append((w, b))
    return params


def pack_params(params):
    """Pack into exact-shape slabs.  Zero-padded rows/cols keep padded lanes
    exactly zero through every layer (gelu(0)=relu(0)=0, zero bias), so the
    padded math equals the unpadded math on the real lanes."""
    # fc1: (62, 128), pad output columns.
    w_first = jnp.zeros((IN_FEATURES, PAD), jnp.float32)
    w_first = w_first.at[:, :LAYER_DIMS[0][1]].set(params[0][0])
    # fc2..fc8: one (7, 128, 128) slab.
    w_mid = jnp.zeros((N_MID, PAD, PAD), jnp.float32)
    for i in range(1, N_LAYERS - 1):
        fi, fo = LAYER_DIMS[i]
        w_mid = w_mid.at[i - 1, :fi, :fo].set(params[i][0])
    # fc9: (128, 32), pad input rows.
    w_last = jnp.zeros((PAD, OUT_FEATURES), jnp.float32)
    w_last = w_last.at[:LAYER_DIMS[-1][0], :].set(params[-1][0])
    # fc1..fc8 biases in one slab; fc9 bias exact.
    b_main = jnp.zeros((N_LAYERS - 1, 1, PAD), jnp.float32)
    for i in range(N_LAYERS - 1):
        b_main = b_main.at[i, 0, :LAYER_DIMS[i][1]].set(params[i][1])
    b_last = params[-1][1].reshape(1, OUT_FEATURES)
    return w_first, w_mid, w_last, b_main, b_last


def _choose_block(batch, block_b):
    """Batch-tile size: multiple of 8, bounded tail padding, and >=2 tiles when
    the batch allows so the 'parallel' grid axis can shard across v7x's 2 TCs."""
    if batch <= 8:
        return 8
    bb = min(block_b, _round_up(pl.cdiv(batch, 2), 8))
    n_tiles = pl.cdiv(batch, bb)
    # Spread rows evenly over the implied tile count (pad < 8 rows per tail).
    return _round_up(pl.cdiv(batch, n_tiles), 8)


@functools.partial(jax.jit, static_argnames=("block_b",))
def mlp_forward(x, w_first, w_mid, w_last, b_main, b_last, *, block_b=2048):
    """x: (B, 62) f32 -> (B, 32) f32."""
    B = x.shape[0]
    bb = _choose_block(B, block_b)
    n_tiles = pl.cdiv(B, bb)      # tail tile's OOB rows are masked on store

    param_bytes = 4 * (IN_FEATURES * PAD + N_MID * PAD * PAD
                       + PAD * OUT_FEATURES + (N_LAYERS - 1) * PAD + OUT_FEATURES)

    # Double-buffered activation tiles + (double-buffered) resident params
    # + generous headroom for the in-kernel (bb, 128) f32 temporaries.
    vmem_bytes = (2 * bb * (IN_FEATURES + OUT_FEATURES) * 4
                  + 2 * param_bytes
                  + 8 * bb * PAD * 4
                  + (2 << 20))
    vmem_limit = int(min(max(vmem_bytes, 16 << 20), 32 << 20))  # fits v7x scoped

    cost = pl.CostEstimate(
        flops=2 * B * (IN_FEATURES * PAD + N_MID * PAD * PAD + PAD * OUT_FEATURES),
        transcendentals=N_GELU * B * PAD,
        bytes_accessed=4 * B * (IN_FEATURES + OUT_FEATURES) + param_bytes,
    )

    return pl.pallas_call(
        mlp_kernel,
        out_shape=jax.ShapeDtypeStruct((B, OUT_FEATURES), jnp.float32),
        grid=(n_tiles,),
        in_specs=[
            # activations: one batch tile per grid step (pipelined)
            pl.BlockSpec((bb, IN_FEATURES), lambda i: (i, 0)),
            # params: same block every step -> stay resident in VMEM
            # (pl.Buffered(1) would free ~0.5 MiB more; skipped, ample headroom)
            pl.BlockSpec((IN_FEATURES, PAD), lambda i: (0, 0)),
            pl.BlockSpec((N_MID, PAD, PAD), lambda i: (0, 0, 0)),
            pl.BlockSpec((PAD, OUT_FEATURES), lambda i: (0, 0)),
            pl.BlockSpec((N_LAYERS - 1, 1, PAD), lambda i: (0, 0, 0)),
            pl.BlockSpec((1, OUT_FEATURES), lambda i: (0, 0)),
        ],
        out_specs=pl.BlockSpec((bb, OUT_FEATURES), lambda i: (i, 0)),
        compiler_params=pltpu.CompilerParams(
            dimension_semantics=("parallel",),   # shard batch tiles across TCs
            vmem_limit_bytes=vmem_limit,
        ),
        cost_estimate=cost,
    )(x, w_first, w_mid, w_last, b_main, b_last)


def reference_forward(x, params, approximate):
    h = x
    for (w, b), act in zip(params, ACTS):
        h = h @ w + b[None, :]
        if act == "gelu":
            h = jax.nn.gelu(h, approximate=approximate)
        elif act == "relu":
            h = jnp.maximum(h, 0.0)
    return h


if __name__ == "__main__":
    key = jax.random.PRNGKey(0)
    key, kx = jax.random.split(key)

    B = 8
    x = jax.random.normal(kx, (B, IN_FEATURES), jnp.float32)

    params = init_params(key)
    packed = pack_params(params)

    out = jax.block_until_ready(mlp_forward(x, *packed))
    assert out.shape == (B, OUT_FEATURES), out.shape

    # Exact match vs. the same (tanh-GELU) math.
    ref_tanh = reference_forward(x, params, approximate=True)
    assert jnp.allclose(out, ref_tanh, atol=1e-3, rtol=1e-3), "mismatch vs tanh ref"
    # Loose match vs. torch's erf-GELU default (tanh approx deviates ~1e-3).
    ref_erf = reference_forward(x, params, approximate=False)
    assert jnp.allclose(out, ref_erf, atol=2e-2, rtol=2e-2), "mismatch vs erf ref"

    # Exercise the multi-tile grid + non-divisible (masked tail) path.
    B2 = 200
    x2 = jax.random.normal(jax.random.PRNGKey(1), (B2, IN_FEATURES), jnp.float32)
    out2 = jax.block_until_ready(mlp_forward(x2, *packed))
    ref2 = reference_forward(x2, params, approximate=True)
    assert out2.shape == (B2, OUT_FEATURES), out2.shape
    assert jnp.allclose(out2, ref2, atol=1e-3, rtol=1e-3), "mismatch on tiled batch"

    print("KERNEL_OK")
</pallas_src>

<mosaic_0001>
module attributes {stable_mosaic.version = 11 : i64} {
  func.func @mlp_kernel(%arg0: i32, %arg1: memref<8x62xf32, #tpu.memory_space<vmem>>, %arg2: memref<62x128xf32, #tpu.memory_space<vmem>>, %arg3: memref<7x128x128xf32, #tpu.memory_space<vmem>>, %arg4: memref<128x32xf32, #tpu.memory_space<vmem>>, %arg5: memref<8x1x128xf32, #tpu.memory_space<vmem>>, %arg6: memref<1x32xf32, #tpu.memory_space<vmem>>, %arg7: memref<8x32xf32, #tpu.memory_space<vmem>>) attributes {dimension_semantics = [#tpu.dimension_semantics<parallel>], iteration_bounds = array<i64: 1>, scalar_prefetch = 0 : i64, scratch_operands = 0 : i64, tpu.core_type = #tpu.core_type<tc>, window_params = [{transform_indices = @transform_0, window_bounds = array<i64: 8, 62>}, {pipeline_mode = #tpu.pipeline_mode<synchronous>, transform_indices = @transform_1, window_bounds = array<i64: 62, 128>}, {pipeline_mode = #tpu.pipeline_mode<synchronous>, transform_indices = @transform_2, window_bounds = array<i64: 7, 128, 128>}, {pipeline_mode = #tpu.pipeline_mode<synchronous>, transform_indices = @transform_3, window_bounds = array<i64: 128, 32>}, {pipeline_mode = #tpu.pipeline_mode<synchronous>, transform_indices = @transform_4, window_bounds = array<i64: 8, 1, 128>}, {pipeline_mode = #tpu.pipeline_mode<synchronous>, transform_indices = @transform_5, window_bounds = array<i64: 1, 32>}, {transform_indices = @transform_6, window_bounds = array<i64: 8, 32>}]} {
    %c0 = arith.constant 0 : index
    %c0_0 = arith.constant 0 : index
    %0 = vector.load %arg1[%c0, %c0_0] : memref<8x62xf32, #tpu.memory_space<vmem>>, vector<8x62xf32>
    %c0_1 = arith.constant 0 : index
    %c0_2 = arith.constant 0 : index
    %1 = vector.load %arg2[%c0_1, %c0_2] : memref<62x128xf32, #tpu.memory_space<vmem>>, vector<62x128xf32>
    %cst = arith.constant dense<0.000000e+00> : vector<8x128xf32>
    %2 = tpu.matmul %0, %1, %cst {dimension_numbers = #tpu.dot_dimension_numbers<[1], [0], [0], [1], [0, 0, 1, 1], [], []>} : vector<8x62xf32>, vector<62x128xf32>, vector<8x128xf32> -> vector<8x128xf32>
    %c0_3 = arith.constant 0 : index
    %c0_4 = arith.constant 0 : index
    %c0_5 = arith.constant 0 : index
    %3 = vector.load %arg5[%c0_3, %c0_4, %c0_5] : memref<8x1x128xf32, #tpu.memory_space<vmem>>, vector<1x1x128xf32>
    %4 = vector.shape_cast %3 : vector<1x1x128xf32> to vector<1x128xf32>
    %5 = vector.broadcast %4 : vector<1x128xf32> to vector<8x128xf32>
    %6 = arith.addf %2, %5 : vector<8x128xf32>
    %7 = arith.mulf %6, %6 : vector<8x128xf32>
    %8 = arith.mulf %6, %7 : vector<8x128xf32>
    %cst_6 = arith.constant 4.471500e-02 : f32
    %9 = vector.broadcast %cst_6 : f32 to vector<8x128xf32>
    %10 = arith.mulf %9, %8 : vector<8x128xf32>
    %11 = arith.addf %6, %10 : vector<8x128xf32>
    %cst_7 = arith.constant 0.797884583 : f32
    %12 = vector.broadcast %cst_7 : f32 to vector<8x128xf32>
    %13 = arith.mulf %12, %11 : vector<8x128xf32>
    %14 = math.tanh %13 : vector<8x128xf32>
    %cst_8 = arith.constant 1.000000e+00 : f32
    %15 = vector.broadcast %cst_8 : f32 to vector<8x128xf32>
    %16 = arith.addf %15, %14 : vector<8x128xf32>
    %cst_9 = arith.constant 5.000000e-01 : f32
    %17 = vector.broadcast %cst_9 : f32 to vector<8x128xf32>
    %18 = arith.mulf %17, %16 : vector<8x128xf32>
    %19 = arith.mulf %6, %18 : vector<8x128xf32>
    %c0_10 = arith.constant 0 : index
    %c0_11 = arith.constant 0 : index
    %c0_12 = arith.constant 0 : index
    %20 = vector.load %arg3[%c0_10, %c0_11, %c0_12] : memref<7x128x128xf32, #tpu.memory_space<vmem>>, vector<1x128x128xf32>
    %21 = vector.shape_cast %20 : vector<1x128x128xf32> to vector<128x128xf32>
    %cst_13 = arith.constant dense<0.000000e+00> : vector<8x128xf32>
    %22 = tpu.matmul %19, %21, %cst_13 {dimension_numbers = #tpu.dot_dimension_numbers<[1], [0], [0], [1], [0, 0, 1, 1], [], []>} : vector<8x128xf32>, vector<128x128xf32>, vector<8x128xf32> -> vector<8x128xf32>
    %c1 = arith.constant 1 : index
    %c0_14 = arith.constant 0 : index
    %c0_15 = arith.constant 0 : index
    %23 = vector.load %arg5[%c1, %c0_14, %c0_15] : memref<8x1x128xf32, #tpu.memory_space<vmem>>, vector<1x1x128xf32>
    %24 = vector.shape_cast %23 : vector<1x1x128xf32> to vector<1x128xf32>
    %25 = vector.broadcast %24 : vector<1x128xf32> to vector<8x128xf32>
    %26 = arith.addf %22, %25 : vector<8x128xf32>
    %27 = arith.mulf %26, %26 : vector<8x128xf32>
    %28 = arith.mulf %26, %27 : vector<8x128xf32>
    %cst_16 = arith.constant 4.471500e-02 : f32
    %29 = vector.broadcast %cst_16 : f32 to vector<8x128xf32>
    %30 = arith.mulf %29, %28 : vector<8x128xf32>
    %31 = arith.addf %26, %30 : vector<8x128xf32>
    %cst_17 = arith.constant 0.797884583 : f32
    %32 = vector.broadcast %cst_17 : f32 to vector<8x128xf32>
    %33 = arith.mulf %32, %31 : vector<8x128xf32>
    %34 = math.tanh %33 : vector<8x128xf32>
    %cst_18 = arith.constant 1.000000e+00 : f32
    %35 = vector.broadcast %cst_18 : f32 to vector<8x128xf32>
    %36 = arith.addf %35, %34 : vector<8x128xf32>
    %cst_19 = arith.constant 5.000000e-01 : f32
    %37 = vector.broadcast %cst_19 : f32 to vector<8x128xf32>
    %38 = arith.mulf %37, %36 : vector<8x128xf32>
    %39 = arith.mulf %26, %38 : vector<8x128xf32>
    %c1_20 = arith.constant 1 : index
    %c0_21 = arith.constant 0 : index
    %c0_22 = arith.constant 0 : index
    %40 = vector.load %arg3[%c1_20, %c0_21, %c0_22] : memref<7x128x128xf32, #tpu.memory_space<vmem>>, vector<1x128x128xf32>
    %41 = vector.shape_cast %40 : vector<1x128x128xf32> to vector<128x128xf32>
    %cst_23 = arith.constant dense<0.000000e+00> : vector<8x128xf32>
    %42 = tpu.matmul %39, %41, %cst_23 {dimension_numbers = #tpu.dot_dimension_numbers<[1], [0], [0], [1], [0, 0, 1, 1], [], []>} : vector<8x128xf32>, vector<128x128xf32>, vector<8x128xf32> -> vector<8x128xf32>
    %c2 = arith.constant 2 : index
    %c0_24 = arith.constant 0 : index
    %c0_25 = arith.constant 0 : index
    %43 = vector.load %arg5[%c2, %c0_24, %c0_25] : memref<8x1x128xf32, #tpu.memory_space<vmem>>, vector<1x1x128xf32>
    %44 = vector.shape_cast %43 : vector<1x1x128xf32> to vector<1x128xf32>
    %45 = vector.broadcast %44 : vector<1x128xf32> to vector<8x128xf32>
    %46 = arith.addf %42, %45 : vector<8x128xf32>
    %47 = arith.mulf %46, %46 : vector<8x128xf32>
    %48 = arith.mulf %46, %47 : vector<8x128xf32>
    %cst_26 = arith.constant 4.471500e-02 : f32
    %49 = vector.broadcast %cst_26 : f32 to vector<8x128xf32>
    %50 = arith.mulf %49, %48 : vector<8x128xf32>
    %51 = arith.addf %46, %50 : vector<8x128xf32>
    %cst_27 = arith.constant 0.797884583 : f32
    %52 = vector.broadcast %cst_27 : f32 to vector<8x128xf32>
    %53 = arith.mulf %52, %51 : vector<8x128xf32>
    %54 = math.tanh %53 : vector<8x128xf32>
    %cst_28 = arith.constant 1.000000e+00 : f32
    %55 = vector.broadcast %cst_28 : f32 to vector<8x128xf32>
    %56 = arith.addf %55, %54 : vector<8x128xf32>
    %cst_29 = arith.constant 5.000000e-01 : f32
    %57 = vector.broadcast %cst_29 : f32 to vector<8x128xf32>
    %58 = arith.mulf %57, %56 : vector<8x128xf32>
    %59 = arith.mulf %46, %58 : vector<8x128xf32>
    %c2_30 = arith.constant 2 : index
    %c0_31 = arith.constant 0 : index
    %c0_32 = arith.constant 0 : index
    %60 = vector.load %arg3[%c2_30, %c0_31, %c0_32] : memref<7x128x128xf32, #tpu.memory_space<vmem>>, vector<1x128x128xf32>
    %61 = vector.shape_cast %60 : vector<1x128x128xf32> to vector<128x128xf32>
    %cst_33 = arith.constant dense<0.000000e+00> : vector<8x128xf32>
    %62 = tpu.matmul %59, %61, %cst_33 {dimension_numbers = #tpu.dot_dimension_numbers<[1], [0], [0], [1], [0, 0, 1, 1], [], []>} : vector<8x128xf32>, vector<128x128xf32>, vector<8x128xf32> -> vector<8x128xf32>
    %c3 = arith.constant 3 : index
    %c0_34 = arith.constant 0 : index
    %c0_35 = arith.constant 0 : index
    %63 = vector.load %arg5[%c3, %c0_34, %c0_35] : memref<8x1x128xf32, #tpu.memory_space<vmem>>, vector<1x1x128xf32>
    %64 = vector.shape_cast %63 : vector<1x1x128xf32> to vector<1x128xf32>
    %65 = vector.broadcast %64 : vector<1x128xf32> to vector<8x128xf32>
    %66 = arith.addf %62, %65 : vector<8x128xf32>
    %67 = arith.mulf %66, %66 : vector<8x128xf32>
    %68 = arith.mulf %66, %67 : vector<8x128xf32>
    %cst_36 = arith.constant 4.471500e-02 : f32
    %69 = vector.broadcast %cst_36 : f32 to vector<8x128xf32>
    %70 = arith.mulf %69, %68 : vector<8x128xf32>
    %71 = arith.addf %66, %70 : vector<8x128xf32>
    %cst_37 = arith.constant 0.797884583 : f32
    %72 = vector.broadcast %cst_37 : f32 to vector<8x128xf32>
    %73 = arith.mulf %72, %71 : vector<8x128xf32>
    %74 = math.tanh %73 : vector<8x128xf32>
    %cst_38 = arith.constant 1.000000e+00 : f32
    %75 = vector.broadcast %cst_38 : f32 to vector<8x128xf32>
    %76 = arith.addf %75, %74 : vector<8x128xf32>
    %cst_39 = arith.constant 5.000000e-01 : f32
    %77 = vector.broadcast %cst_39 : f32 to vector<8x128xf32>
    %78 = arith.mulf %77, %76 : vector<8x128xf32>
    %79 = arith.mulf %66, %78 : vector<8x128xf32>
    %c3_40 = arith.constant 3 : index
    %c0_41 = arith.constant 0 : index
    %c0_42 = arith.constant 0 : index
    %80 = vector.load %arg3[%c3_40, %c0_41, %c0_42] : memref<7x128x128xf32, #tpu.memory_space<vmem>>, vector<1x128x128xf32>
    %81 = vector.shape_cast %80 : vector<1x128x128xf32> to vector<128x128xf32>
    %cst_43 = arith.constant dense<0.000000e+00> : vector<8x128xf32>
    %82 = tpu.matmul %79, %81, %cst_43 {dimension_numbers = #tpu.dot_dimension_numbers<[1], [0], [0], [1], [0, 0, 1, 1], [], []>} : vector<8x128xf32>, vector<128x128xf32>, vector<8x128xf32> -> vector<8x128xf32>
    %c4 = arith.constant 4 : index
    %c0_44 = arith.constant 0 : index
    %c0_45 = arith.constant 0 : index
    %83 = vector.load %arg5[%c4, %c0_44, %c0_45] : memref<8x1x128xf32, #tpu.memory_space<vmem>>, vector<1x1x128xf32>
    %84 = vector.shape_cast %83 : vector<1x1x128xf32> to vector<1x128xf32>
    %85 = vector.broadcast %84 : vector<1x128xf32> to vector<8x128xf32>
    %86 = arith.addf %82, %85 : vector<8x128xf32>
    %cst_46 = arith.constant 0.000000e+00 : f32
    %87 = vector.broadcast %cst_46 : f32 to vector<8x128xf32>
    %88 = arith.maximumf %86, %87 : vector<8x128xf32>
    %c4_47 = arith.constant 4 : index
    %c0_48 = arith.constant 0 : index
    %c0_49 = arith.constant 0 : index
    %89 = vector.load %arg3[%c4_47, %c0_48, %c0_49] : memref<7x128x128xf32, #tpu.memory_space<vmem>>, vector<1x128x128xf32>
    %90 = vector.shape_cast %89 : vector<1x128x128xf32> to vector<128x128xf32>
    %cst_50 = arith.constant dense<0.000000e+00> : vector<8x128xf32>
    %91 = tpu.matmul %88, %90, %cst_50 {dimension_numbers = #tpu.dot_dimension_numbers<[1], [0], [0], [1], [0, 0, 1, 1], [], []>} : vector<8x128xf32>, vector<128x128xf32>, vector<8x128xf32> -> vector<8x128xf32>
    %c5 = arith.constant 5 : index
    %c0_51 = arith.constant 0 : index
    %c0_52 = arith.constant 0 : index
    %92 = vector.load %arg5[%c5, %c0_51, %c0_52] : memref<8x1x128xf32, #tpu.memory_space<vmem>>, vector<1x1x128xf32>
    %93 = vector.shape_cast %92 : vector<1x1x128xf32> to vector<1x128xf32>
    %94 = vector.broadcast %93 : vector<1x128xf32> to vector<8x128xf32>
    %95 = arith.addf %91, %94 : vector<8x128xf32>
    %96 = arith.mulf %95, %95 : vector<8x128xf32>
    %97 = arith.mulf %95, %96 : vector<8x128xf32>
    %cst_53 = arith.constant 4.471500e-02 : f32
    %98 = vector.broadcast %cst_53 : f32 to vector<8x128xf32>
    %99 = arith.mulf %98, %97 : vector<8x128xf32>
    %100 = arith.addf %95, %99 : vector<8x128xf32>
    %cst_54 = arith.constant 0.797884583 : f32
    %101 = vector.broadcast %cst_54 : f32 to vector<8x128xf32>
    %102 = arith.mulf %101, %100 : vector<8x128xf32>
    %103 = math.tanh %102 : vector<8x128xf32>
    %cst_55 = arith.constant 1.000000e+00 : f32
    %104 = vector.broadcast %cst_55 : f32 to vector<8x128xf32>
    %105 = arith.addf %104, %103 : vector<8x128xf32>
    %cst_56 = arith.constant 5.000000e-01 : f32
    %106 = vector.broadcast %cst_56 : f32 to vector<8x128xf32>
    %107 = arith.mulf %106, %105 : vector<8x128xf32>
    %108 = arith.mulf %95, %107 : vector<8x128xf32>
    %c5_57 = arith.constant 5 : index
    %c0_58 = arith.constant 0 : index
    %c0_59 = arith.constant 0 : index
    %109 = vector.load %arg3[%c5_57, %c0_58, %c0_59] : memref<7x128x128xf32, #tpu.memory_space<vmem>>, vector<1x128x128xf32>
    %110 = vector.shape_cast %109 : vector<1x128x128xf32> to vector<128x128xf32>
    %cst_60 = arith.constant dense<0.000000e+00> : vector<8x128xf32>
    %111 = tpu.matmul %108, %110, %cst_60 {dimension_numbers = #tpu.dot_dimension_numbers<[1], [0], [0], [1], [0, 0, 1, 1], [], []>} : vector<8x128xf32>, vector<128x128xf32>, vector<8x128xf32> -> vector<8x128xf32>
    %c6 = arith.constant 6 : index
    %c0_61 = arith.constant 0 : index
    %c0_62 = arith.constant 0 : index
    %112 = vector.load %arg5[%c6, %c0_61, %c0_62] : memref<8x1x128xf32, #tpu.memory_space<vmem>>, vector<1x1x128xf32>
    %113 = vector.shape_cast %112 : vector<1x1x128xf32> to vector<1x128xf32>
    %114 = vector.broadcast %113 : vector<1x128xf32> to vector<8x128xf32>
    %115 = arith.addf %111, %114 : vector<8x128xf32>
    %116 = arith.mulf %115, %115 : vector<8x128xf32>
    %117 = arith.mulf %115, %116 : vector<8x128xf32>
    %cst_63 = arith.constant 4.471500e-02 : f32
    %118 = vector.broadcast %cst_63 : f32 to vector<8x128xf32>
    %119 = arith.mulf %118, %117 : vector<8x128xf32>
    %120 = arith.addf %115, %119 : vector<8x128xf32>
    %cst_64 = arith.constant 0.797884583 : f32
    %121 = vector.broadcast %cst_64 : f32 to vector<8x128xf32>
    %122 = arith.mulf %121, %120 : vector<8x128xf32>
    %123 = math.tanh %122 : vector<8x128xf32>
    %cst_65 = arith.constant 1.000000e+00 : f32
    %124 = vector.broadcast %cst_65 : f32 to vector<8x128xf32>
    %125 = arith.addf %124, %123 : vector<8x128xf32>
    %cst_66 = arith.constant 5.000000e-01 : f32
    %126 = vector.broadcast %cst_66 : f32 to vector<8x128xf32>
    %127 = arith.mulf %126, %125 : vector<8x128xf32>
    %128 = arith.mulf %115, %127 : vector<8x128xf32>
    %c6_67 = arith.constant 6 : index
    %c0_68 = arith.constant 0 : index
    %c0_69 = arith.constant 0 : index
    %129 = vector.load %arg3[%c6_67, %c0_68, %c0_69] : memref<7x128x128xf32, #tpu.memory_space<vmem>>, vector<1x128x128xf32>
    %130 = vector.shape_cast %129 : vector<1x128x128xf32> to vector<128x128xf32>
    %cst_70 = arith.constant dense<0.000000e+00> : vector<8x128xf32>
    %131 = tpu.matmul %128, %130, %cst_70 {dimension_numbers = #tpu.dot_dimension_numbers<[1], [0], [0], [1], [0, 0, 1, 1], [], []>} : vector<8x128xf32>, vector<128x128xf32>, vector<8x128xf32> -> vector<8x128xf32>
    %c7 = arith.constant 7 : index
    %c0_71 = arith.constant 0 : index
    %c0_72 = arith.constant 0 : index
    %132 = vector.load %arg5[%c7, %c0_71, %c0_72] : memref<8x1x128xf32, #tpu.memory_space<vmem>>, vector<1x1x128xf32>
    %133 = vector.shape_cast %132 : vector<1x1x128xf32> to vector<1x128xf32>
    %134 = vector.broadcast %133 : vector<1x128xf32> to vector<8x128xf32>
    %135 = arith.addf %131, %134 : vector<8x128xf32>
    %136 = arith.mulf %135, %135 : vector<8x128xf32>
    %137 = arith.mulf %135, %136 : vector<8x128xf32>
    %cst_73 = arith.constant 4.471500e-02 : f32
    %138 = vector.broadcast %cst_73 : f32 to vector<8x128xf32>
    %139 = arith.mulf %138, %137 : vector<8x128xf32>
    %140 = arith.addf %135, %139 : vector<8x128xf32>
    %cst_74 = arith.constant 0.797884583 : f32
    %141 = vector.broadcast %cst_74 : f32 to vector<8x128xf32>
    %142 = arith.mulf %141, %140 : vector<8x128xf32>
    %143 = math.tanh %142 : vector<8x128xf32>
    %cst_75 = arith.constant 1.000000e+00 : f32
    %144 = vector.broadcast %cst_75 : f32 to vector<8x128xf32>
    %145 = arith.addf %144, %143 : vector<8x128xf32>
    %cst_76 = arith.constant 5.000000e-01 : f32
    %146 = vector.broadcast %cst_76 : f32 to vector<8x128xf32>
    %147 = arith.mulf %146, %145 : vector<8x128xf32>
    %148 = arith.mulf %135, %147 : vector<8x128xf32>
    %c0_77 = arith.constant 0 : index
    %c0_78 = arith.constant 0 : index
    %149 = vector.load %arg4[%c0_77, %c0_78] : memref<128x32xf32, #tpu.memory_space<vmem>>, vector<128x32xf32>
    %cst_79 = arith.constant dense<0.000000e+00> : vector<8x32xf32>
    %150 = tpu.matmul %148, %149, %cst_79 {dimension_numbers = #tpu.dot_dimension_numbers<[1], [0], [0], [1], [0, 0, 1, 1], [], []>} : vector<8x128xf32>, vector<128x32xf32>, vector<8x32xf32> -> vector<8x32xf32>
    %c0_80 = arith.constant 0 : index
    %c0_81 = arith.constant 0 : index
    %151 = vector.load %arg6[%c0_80, %c0_81] : memref<1x32xf32, #tpu.memory_space<vmem>>, vector<1x32xf32>
    %152 = vector.broadcast %151 : vector<1x32xf32> to vector<8x32xf32>
    %153 = arith.addf %150, %152 : vector<8x32xf32>
    %c0_82 = arith.constant 0 : index
    %c0_83 = arith.constant 0 : index
    %154 = vector.load %arg7[%c0_82, %c0_83] : memref<8x32xf32, #tpu.memory_space<vmem>>, vector<8x32xf32>
    tpu.vector_store %arg7[%c0_82, %c0_83], %153 {strides = array<i32>} : memref<8x32xf32, #tpu.memory_space<vmem>>, vector<8x32xf32>,
    return
  }
  func.func @transform_0(%arg0: i32) -> (i32, i32) {
    %c0_i32 = arith.constant 0 : i32
    %c0_i32_0 = arith.constant 0 : i32
    return %arg0, %c0_i32 : i32, i32
  }
  func.func @transform_1(%arg0: i32) -> (i32, i32) {
    %c0_i32 = arith.constant 0 : i32
    %c0_i32_0 = arith.constant 0 : i32
    %c0_i32_1 = arith.constant 0 : i32
    return %c0_i32, %c0_i32_0 : i32, i32
  }
  func.func @transform_2(%arg0: i32) -> (i32, i32, i32) {
    %c0_i32 = arith.constant 0 : i32
    %c0_i32_0 = arith.constant 0 : i32
    %c0_i32_1 = arith.constant 0 : i32
    %c0_i32_2 = arith.constant 0 : i32
    return %c0_i32, %c0_i32_0, %c0_i32_1 : i32, i32, i32
  }
  func.func @transform_3(%arg0: i32) -> (i32, i32) {
    %c0_i32 = arith.constant 0 : i32
    %c0_i32_0 = arith.constant 0 : i32
    %c0_i32_1 = arith.constant 0 : i32
    return %c0_i32, %c0_i32_0 : i32, i32
  }
  func.func @transform_4(%arg0: i32) -> (i32, i32, i32) {
    %c0_i32 = arith.constant 0 : i32
    %c0_i32_0 = arith.constant 0 : i32
    %c0_i32_1 = arith.constant 0 : i32
    %c0_i32_2 = arith.constant 0 : i32
    return %c0_i32, %c0_i32_0, %c0_i32_1 : i32, i32, i32
  }
  func.func @transform_5(%arg0: i32) -> (i32, i32) {
    %c0_i32 = arith.constant 0 : i32
    %c0_i32_0 = arith.constant 0 : i32
    %c0_i32_1 = arith.constant 0 : i32
    return %c0_i32, %c0_i32_0 : i32, i32
  }
  func.func @transform_6(%arg0: i32) -> (i32, i32) {
    %c0_i32 = arith.constant 0 : i32
    %c0_i32_0 = arith.constant 0 : i32
    return %arg0, %c0_i32 : i32, i32
  }
}

</mosaic_0001>

<bundles_post_ra>
// kernel: mlp_forward.1
= control target key start
LH: loop header
LB: loop body
LE: loop exit
PB: predicated region body
PF: predicated region fallthrough
CT: control target
= control target key end

     0   :  { %11 = vsyncpa [#allocation3], 0  ;;  %s1962_s0 = inlined_call_operand.vmem [shape: f32[8,62], index: 0, kind: input, shape index: {}]   ;;  %s1963_s1 = inlined_call_operand.vmem [shape: f32[62,128], index: 1, kind: input, shape index: {}]   ;;  %s1964_s2 = inlined_call_operand.hbm [shape: f32[7,128,128], index: 2, kind: input, shape index: {}]   ;;  %s1965_s3 = inlined_call_operand.vmem [shape: f32[128,32], index: 3, kind: input, shape index: {}]   ;;  %s1966_s4 = inlined_call_operand.vmem [shape: f32[8,1,128], index: 4, kind: input, shape index: {}]   ;;  %s1967_s5 = inlined_call_operand.vmem [shape: f32[1,32], index: 5, kind: input, shape index: {}]   ;;  %s1968_s6 = inlined_call_operand.hbm [shape: f32[8,32], index: 6, kind: output, shape index: {}]  }
   0x1   :  { %12 = vsyncpa [#allocation4], 0  ;;  %s1707_s21 = smov [#allocation2]   ;;  %s1659_s25 = scalar_lea.hbm %s1964_s2, 14336 }
   0x2   :  { %s22_s22 = sshll.u32 %s1707_s21, 4  ;;  %p1660_p0 = scmp.ne.s32.totalorder %s1964_s2, %s1659_s25  ;;  %s23_s22 = int_to_ptr.vmem [resolvable:$true] %s22_s22 }
   0x3   :  { %p1663_p1 = scmp.lt.u32.totalorder %s1659_s25, %s1964_s2 }
   0x5   :  { %p1665_p2 = pnand %p1663_p1, %p1660_p0 }
   0x7   :  { %1668 = shalt.err (!%p1665_p2)
}
   0x8   :  { %s1669_s30 = scalar_lea.vmem %s23_s22, 14336  ;;  %p1674_p4 = scmp.lt.s32.totalorder %s23_s22, %s23_s22 }
   0x9   :  { %p1670_p3 = scmp.ne.s32.totalorder %s23_s22, %s1669_s30  ;;  %p1675_p5 = scmp.lt.s32.totalorder %s1669_s30, %s1669_s30 }
   0xb   :  { %p1676_p6 = por %p1675_p5, %p1674_p4 }
   0xd   :  { %p1677_p7 = pnand %p1676_p6, %p1670_p3 }
   0xf   :  { %1680 = shalt.err (!%p1677_p7)
}
  0x10   :  { %s1708_s7 = smov 128   ;;  %s1709_s8 = smov 8  }
  0x11   :  { %28 = dma.hbm_to_vmem [thread:$0]  %s1964_s2, 14336, %s23_s22, [#allocation3], %s1708_s7, %s1708_s7, %s1709_s8  }
  0x12   :  { %1703 = dma.done.wait [#allocation3], 14336  }
  0x13   :  { %1704 = vsyncadd [#allocation3], 4294952960  ;;  %v1710_v0 = vmov 0.0|0.0   ;;  %vm1711_vm0 = vmmov 0   ;;  %v1712_v1 = vmov 0.0   ;;  %v39_v2 = vld [vmem:[%s1963_s1] sm:$0xff] }
  0x14   :  { %1432 = vmatprep.subr.bf16.mxu0 %v1710_v0  ;;  %1445 = vmatprep.subr.bf16.mxu1 %v1710_v0  ;;  %v40_v3 = vld [vmem:[%s1963_s1 + $0x8] sm:$0xff]  ;;  %v41_v4 = vld [vmem:[%s1963_s1 + $0x10] sm:$0xff]  ;;  %v42_v6 = vld [vmem:[%s1963_s1 + $0x18] sm:$0xff]  ;;  %vm58_vm1 = vcmask 1045504   ;;  %vm1713_vm2 = vmmov 1   ;;  %vm54_vm4 = vcmask 506880  }
  0x15   :  { %1149 = vmatprep.mubr.msk.f32.mxu0 %vm1711_vm0, %v1712_v1  ;;  %1184 = vmatprep.mubr.msk.f32.mxu1 %vm1711_vm0, %v1712_v1  ;;  %v1433_v5 = vpack.c.bf16 %v40_v3, %v39_v2  ;;  %v1436_v7 = vpack.c.bf16 %v42_v6, %v41_v4  ;;  %v141_v8 = vld [vmem:[#allocation2] sm:$0xff]  ;;  %v142_v9 = vld [vmem:[#allocation2 + $0x8] sm:$0xff]  ;;  %v45_v14 = vld [vmem:[%s1963_s1 + $0x30] sm:$0xff]  ;;  %s1714_s23 = smov [#allocation5]   ;;  %vm953_vm5 = vcmask 261120  }
  0x16   :  { %v43_v10 = vld [vmem:[%s1963_s1 + $0x20] sm:$0xff]  ;;  %v44_v11 = vld [vmem:[%s1963_s1 + $0x28] sm:$0xff]  ;;  %v1446_v12 = vpack.c.bf16 %v142_v9, %v141_v8  ;;  %v46_v15 = vld [vmem:[%s1963_s1 + $0x38] sm:$0x3f] }
  0x17   :  { %1434 = vmatpush3.bf16.msra.mxu0 %v1433_v5  ;;  %v1439_v13 = vpack.c.bf16 %v44_v11, %v43_v10  ;;  %v1442_v16 = vpack.c.bf16 %v46_v15, %v45_v14  ;;  %vm1443_vm3 = vmpackc.low %vm58_vm1, %vm1713_vm2  ;;  %v38_v17 = vld [vmem:[%s1962_s0] sm:$0xff]  ;;  %v143_v18 = vld [vmem:[#allocation2 + $0x10] sm:$0xff] }
  0x18   :  { %1435 = vmatprep.subr.bf16.mxu0 %v1710_v0  ;;  %1447 = vmatpush3.bf16.msra.mxu1 %v1446_v12  ;;  %v144_v19 = vld [vmem:[#allocation2 + $0x18] sm:$0xff]  ;;  %v145_v21 = vld [vmem:[#allocation2 + $0x20] sm:$0xff]  ;;  %v146_v22 = vld [vmem:[#allocation2 + $0x28] sm:$0xff] }
  0x19   :  { %1448 = vmatprep.subr.bf16.mxu1 %v1710_v0  ;;  %v1449_v20 = vpack.c.bf16 %v144_v19, %v143_v18  ;;  %v1452_v23 = vpack.c.bf16 %v146_v22, %v145_v21  ;;  %v147_v24 = vld [vmem:[#allocation2 + $0x30] sm:$0xff]  ;;  %v148_v25 = vld [vmem:[#allocation2 + $0x38] sm:$0xff]  ;;  %v149_v27 = vld [vmem:[#allocation2 + $0x40] sm:$0xff] }
  0x1a   :  { %v1455_v26 = vpack.c.bf16 %v148_v25, %v147_v24  ;;  %v150_v28 = vld [vmem:[#allocation2 + $0x48] sm:$0xff]  ;;  %v151_v30 = vld [vmem:[#allocation2 + $0x50] sm:$0xff]  ;;  %v152_v31 = vld [vmem:[#allocation2 + $0x58] sm:$0xff] }
  0x1b   :  { %1437 = vmatpush3.bf16.msra.mxu0 %v1436_v7  ;;  %v1458_v29 = vpack.c.bf16 %v150_v28, %v149_v27  ;;  %v1461_v32 = vpack.c.bf16 %v152_v31, %v151_v30  ;;  %v153_v33 = vld [vmem:[#allocation2 + $0x60] sm:$0xff]  ;;  %v154_v34 = vld [vmem:[#allocation2 + $0x68] sm:$0xff]  ;;  %v155_v36 = vld [vmem:[#allocation2 + $0x70] sm:$0xff] }
  0x1c   :  { %1438 = vmatprep.subr.bf16.mxu0 %v1710_v0  ;;  %1450 = vmatpush3.bf16.msra.mxu1 %v1449_v20  ;;  %v1464_v35 = vpack.c.bf16 %v154_v34, %v153_v33  ;;  %v156_v37 = vld [vmem:[#allocation2 + $0x78] sm:$0xff]  ;;  %v245_v39 = vld [vmem:[#allocation2 + $0x80] sm:$0xff]  ;;  %v246_v40 = vld [vmem:[#allocation2 + $0x88] sm:$0xff] }
  0x1d   :  { %1451 = vmatprep.subr.bf16.mxu1 %v1710_v0  ;;  %v1467_v38 = vpack.c.bf16 %v156_v37, %v155_v36  ;;  %v1470_v41 = vpack.c.bf16 %v246_v40, %v245_v39  ;;  %v970_v42 = vld [vmem:[%s1966_s4] ss:$0 sm:$0xff]  ;;  %v247_v55 = vld [vmem:[#allocation2 + $0x90] sm:$0xff]  ;;  %v248_v56 = vld [vmem:[#allocation2 + $0x98] sm:$0xff] }
  0x1e   :  { %v1473_v57 = vpack.c.bf16 %v248_v56, %v247_v55  ;;  %v249_v58 = vld [vmem:[#allocation2 + $0xa0] sm:$0xff]  ;;  %v250_v59 = vld [vmem:[#allocation2 + $0xa8] sm:$0xff]  ;;  %v251_v61 = vld [vmem:[#allocation2 + $0xb0] sm:$0xff] }
  0x1f   :  { %1440 = vmatpush3.bf16.msra.mxu0 %v1439_v13  ;;  %v1476_v60 = vpack.c.bf16 %v250_v59, %v249_v58  ;;  %v252_v62 = vld [vmem:[#allocation2 + $0xb8] sm:$0xff]  ;;  %v253_v2 = vld [vmem:[#allocation2 + $0xc0] sm:$0xff]  ;;  %v254_v3 = vld [vmem:[#allocation2 + $0xc8] sm:$0xff] }
  0x20   :  { %1441 = vmatprep.subr.bf16.mxu0 %v1710_v0  ;;  %1453 = vmatpush3.bf16.msra.mxu1 %v1452_v23  ;;  %v1479_v63 = vpack.c.bf16 %v252_v62, %v251_v61  ;;  %v1482_v4 = vpack.c.bf16 %v254_v3, %v253_v2  ;;  %v255_v5 = vld [vmem:[#allocation2 + $0xd0] sm:$0xff]  ;;  %v256_v6 = vld [vmem:[#allocation2 + $0xd8] sm:$0xff]  ;;  %v257_v8 = vld [vmem:[#allocation2 + $0xe0] sm:$0xff] }
  0x21   :  { %1454 = vmatprep.subr.bf16.mxu1 %v1710_v0  ;;  %v1485_v7 = vpack.c.bf16 %v256_v6, %v255_v5  ;;  %v258_v9 = vld [vmem:[#allocation2 + $0xe8] sm:$0xff]  ;;  %v259_v11 = vld [vmem:[#allocation2 + $0xf0] sm:$0xff]  ;;  %v260_v12 = vld [vmem:[#allocation2 + $0xf8] sm:$0xff] }
  0x22   :  { %v1488_v10 = vpack.c.bf16 %v258_v9, %v257_v8  ;;  %v1491_v13 = vpack.c.bf16 %v260_v12, %v259_v11  ;;  %v349_v14 = vld [vmem:[#allocation2 + $0x100] sm:$0xff]  ;;  %v350_v15 = vld [vmem:[#allocation2 + $0x108] sm:$0xff]  ;;  %v351_v30 = vld [vmem:[#allocation2 + $0x110] sm:$0xff] }
  0x23   :  { %1444 = vmatpush3.bf16.msk.msra.mxu0 %vm1443_vm3, %v1442_v16  ;;  %v1494_v16 = vpack.c.bf16 %v350_v15, %v349_v14  ;;  %v352_v31 = vld [vmem:[#allocation2 + $0x118] sm:$0xff]  ;;  %v353_v33 = vld [vmem:[#allocation2 + $0x120] sm:$0xff]  ;;  %v354_v34 = vld [vmem:[#allocation2 + $0x128] sm:$0xff] }
  0x24   :  { %1469 = vmatprep.subr.bf16.mxu0 %v1710_v0  ;;  %1456 = vmatpush3.bf16.msra.mxu1 %v1455_v26  ;;  %v355_v36 = vld [vmem:[#allocation2 + $0x130] sm:$0xff]  ;;  %v356_v37 = vld [vmem:[#allocation2 + $0x138] sm:$0xff]  ;;  %v357_v39 = vld [vmem:[#allocation2 + $0x140] sm:$0xff] }
  0x25   :  { %1457 = vmatprep.subr.bf16.mxu1 %v1710_v0  ;;  %v358_v40 = vld [vmem:[#allocation2 + $0x148] sm:$0xff]  ;;  %v455_v5 = vld [vmem:[#allocation2 + $0x190] sm:$0xff]  ;;  %v456_v6 = vld [vmem:[#allocation2 + $0x198] sm:$0xff] }
  0x26   :  { %1150 = vmatmul.mubr.msk.f32.vlgmr.msra.gmra.mrb[0].mxu0 %vm54_vm4, %v38_v17  ;;  %v974_v17 = vld [vmem:[%s1966_s4 + $0x1] ss:$0 sm:$0xff]  ;;  %v458_v9 = vld [vmem:[#allocation2 + $0x1a8] sm:$0xff]  ;;  %v459_v11 = vld [vmem:[#allocation2 + $0x1b0] sm:$0xff] }
  0x27   :  { %1219 = vmatprep.mubr.msk.f32.mxu0 %vm1711_vm0, %v1712_v1  ;;  %1471 = vmatpush3.bf16.msra.mxu0 %v1470_v41  ;;  %v1506_v41 = vpack.c.bf16 %v358_v40, %v357_v39  ;;  %v457_v8 = vld [vmem:[#allocation2 + $0x1a0] sm:$0xff]  ;;  %v460_v12 = vld [vmem:[#allocation2 + $0x1b8] sm:$0xff]  ;;  %v462_v15 = vld [vmem:[#allocation2 + $0x1c8] sm:$0xff] }
  0x28   :  { %1459 = vmatpush3.bf16.msra.mxu1 %v1458_v29  ;;  %1472 = vmatprep.subr.bf16.mxu0 %v1710_v0  ;;  %v461_v14 = vld [vmem:[#allocation2 + $0x1c0] sm:$0xff]  ;;  %v558_v39 = vld [vmem:[#allocation2 + $0x248] sm:$0xff] }
  0x29   :  { %1460 = vmatprep.subr.bf16.mxu1 %v1710_v0 }
  0x2b   :  { %1474 = vmatpush3.bf16.msra.mxu0 %v1473_v57 }
  0x2c   :  { %1462 = vmatpush3.bf16.msra.mxu1 %v1461_v32  ;;  %1475 = vmatprep.subr.bf16.mxu0 %v1710_v0  ;;  %v1497_v32 = vpack.c.bf16 %v352_v31, %v351_v30  ;;  %v552_v30 = vld [vmem:[#allocation2 + $0x218] sm:$0xff] }
  0x2d   :  { %1463 = vmatprep.subr.bf16.mxu1 %v1710_v0 }
  0x2f   :  { %1477 = vmatpush3.bf16.msra.mxu0 %v1476_v60 }
  0x30   :  { %1465 = vmatpush3.bf16.msra.mxu1 %v1464_v35  ;;  %1478 = vmatprep.subr.bf16.mxu0 %v1710_v0  ;;  %v1500_v35 = vpack.c.bf16 %v354_v34, %v353_v33  ;;  %v554_v33 = vld [vmem:[#allocation2 + $0x228] sm:$0xff] }
  0x31   :  { %1466 = vmatprep.subr.bf16.mxu1 %v1710_v0 }
  0x33   :  { %1480 = vmatpush3.bf16.msra.mxu0 %v1479_v63 }
  0x34   :  { %1468 = vmatpush3.bf16.msra.mxu1 %v1467_v38  ;;  %1481 = vmatprep.subr.bf16.mxu0 %v1710_v0  ;;  %v1503_v38 = vpack.c.bf16 %v356_v37, %v355_v36  ;;  %v556_v36 = vld [vmem:[#allocation2 + $0x238] sm:$0xff] }
  0x35   :  { %1493 = vmatprep.subr.bf16.mxu1 %v1710_v0 }
  0x37   :  { %1483 = vmatpush3.bf16.msra.mxu0 %v1482_v4 }
  0x38   :  { %1484 = vmatprep.subr.bf16.mxu0 %v1710_v0 }
  0x3b   :  { %1486 = vmatpush3.bf16.msra.mxu0 %v1485_v7  ;;  %v1521_v7 = vpack.c.bf16 %v456_v6, %v455_v5 }
  0x3c   :  { %1487 = vmatprep.subr.bf16.mxu0 %v1710_v0 }
  0x3f   :  { %1489 = vmatpush3.bf16.msra.mxu0 %v1488_v10  ;;  %v1524_v10 = vpack.c.bf16 %v458_v9, %v457_v8  ;;  %v655_v9 = vld [vmem:[#allocation2 + $0x290] sm:$0xff] }
  0x40   :  { %1490 = vmatprep.subr.bf16.mxu0 %v1710_v0 }
  0x43   :  { %1492 = vmatpush3.bf16.msra.mxu0 %v1491_v13  ;;  %v1527_v13 = vpack.c.bf16 %v460_v12, %v459_v11  ;;  %v657_v12 = vld [vmem:[#allocation2 + $0x2a0] sm:$0xff] }
  0x44   :  { %1517 = vmatprep.subr.bf16.mxu0 %v1710_v0 }
  0xf9   :  { %v128_v43 = vpop.f32.mrb[0].mxu0 }
  0xfa   :  { %v129_v44 = vadd.f32 %v970_v42, %v128_v43  ;;  %v1151_v45 = vpop.f32.mrb[1].mxu0  ;;  %v359_v42 = vld [vmem:[#allocation2 + $0x150] sm:$0xff]  ;;  %v360_v43 = vld [vmem:[#allocation2 + $0x158] sm:$0xff] }
  0xfb   :  { %v361_v45 = vld [vmem:[#allocation2 + $0x160] sm:$0xff] }
  0xfc   :  { %v132_v46 = vmul.f32 %v129_v44, %v129_v44 }
  0xfe   :  { %v133_v47 = vmul.f32 %v132_v46, %v129_v44  ;;  %v362_v46 = vld [vmem:[#allocation2 + $0x168] sm:$0xff] }
 0x100   :  { %v134_v48 = vmul.f32 0.044715, %v133_v47  ;;  %v1512_v47 = vpack.c.bf16 %v362_v46, %v361_v45  ;;  %v562_v45 = vld [vmem:[#allocation2 + $0x268] sm:$0xff] }
 0x102   :  { %v135_v49 = vadd.f32 %v134_v48, %v129_v44  ;;  %v363_v48 = vld [vmem:[#allocation2 + $0x170] sm:$0xff] }
 0x104   :  { %v136_v50 = vmul.f32 0.7978846, %v135_v49  ;;  %v364_v49 = vld [vmem:[#allocation2 + $0x178] sm:$0xff] }
 0x106   :  { %1645 = vtanh.f32 %v136_v50  ;;  %v1515_v50 = vpack.c.bf16 %v364_v49, %v363_v48 }
 0x110   :  { %v1646_v51 = vpop.eup %1645 }
 0x111   :  { %v138_v52 = vadd.f32 1.0, %v1646_v51  ;;  %v453_v51 = vld [vmem:[#allocation2 + $0x180] sm:$0xff] }
 0x113   :  { %v139_v53 = vmul.f32 0.5, %v138_v52  ;;  %v454_v52 = vld [vmem:[#allocation2 + $0x188] sm:$0xff] }
 0x115   :  { %v140_v54 = vmul.f32 %v139_v53, %v129_v44  ;;  %v1509_v44 = vpack.c.bf16 %v360_v43, %v359_v42  ;;  %v1518_v53 = vpack.c.bf16 %v454_v52, %v453_v51  ;;  %v560_v42 = vld [vmem:[#allocation2 + $0x258] sm:$0xff] }
 0x117   :  { %1185 = vmatmul.mubr.f32.vlgmr.msra.gmra.mrb[0].mxu1 %v140_v54  ;;  %v976_v54 = vld [vmem:[%s1966_s4 + $0x2] ss:$0 sm:$0xff] }
 0x118   :  { %1254 = vmatprep.mubr.msk.f32.mxu1 %vm1711_vm0, %v1712_v1  ;;  %1495 = vmatpush3.bf16.msra.mxu1 %v1494_v16  ;;  %v1530_v16 = vpack.c.bf16 %v462_v15, %v461_v14  ;;  %v659_v15 = vld [vmem:[#allocation2 + $0x2b0] sm:$0xff] }
 0x119   :  { %1496 = vmatprep.subr.bf16.mxu1 %v1710_v0 }
 0x11c   :  { %1498 = vmatpush3.bf16.msra.mxu1 %v1497_v32  ;;  %v553_v32 = vld [vmem:[#allocation2 + $0x220] sm:$0xff] }
 0x11d   :  { %1499 = vmatprep.subr.bf16.mxu1 %v1710_v0  ;;  %v1548_v34 = vpack.c.bf16 %v554_v33, %v553_v32  ;;  %v982_v33 = vld [vmem:[%s1966_s4 + $0x5] ss:$0 sm:$0xff] }
 0x120   :  { %1501 = vmatpush3.bf16.msra.mxu1 %v1500_v35  ;;  %v555_v35 = vld [vmem:[#allocation2 + $0x230] sm:$0xff] }
 0x121   :  { %1502 = vmatprep.subr.bf16.mxu1 %v1710_v0  ;;  %v1551_v37 = vpack.c.bf16 %v556_v36, %v555_v35 }
 0x124   :  { %1504 = vmatpush3.bf16.msra.mxu1 %v1503_v38  ;;  %v557_v38 = vld [vmem:[#allocation2 + $0x240] sm:$0xff] }
 0x125   :  { %1505 = vmatprep.subr.bf16.mxu1 %v1710_v0  ;;  %v1554_v40 = vpack.c.bf16 %v558_v39, %v557_v38 }
 0x128   :  { %1507 = vmatpush3.bf16.msra.mxu1 %v1506_v41  ;;  %v559_v41 = vld [vmem:[#allocation2 + $0x250] sm:$0xff] }
 0x129   :  { %1508 = vmatprep.subr.bf16.mxu1 %v1710_v0  ;;  %v1557_v43 = vpack.c.bf16 %v560_v42, %v559_v41 }
 0x12c   :  { %1510 = vmatpush3.bf16.msra.mxu1 %v1509_v44  ;;  %v561_v44 = vld [vmem:[#allocation2 + $0x260] sm:$0xff] }
 0x12d   :  { %1511 = vmatprep.subr.bf16.mxu1 %v1710_v0  ;;  %v1560_v46 = vpack.c.bf16 %v562_v45, %v561_v44 }
 0x130   :  { %1513 = vmatpush3.bf16.msra.mxu1 %v1512_v47  ;;  %v978_v47 = vld [vmem:[%s1966_s4 + $0x3] ss:$0 sm:$0xff] }
 0x131   :  { %1514 = vmatprep.subr.bf16.mxu1 %v1710_v0 }
 0x134   :  { %1516 = vmatpush3.bf16.msra.mxu1 %v1515_v50 }
 0x135   :  { %1541 = vmatprep.subr.bf16.mxu1 %v1710_v0 }
 0x1ea   :  { %v231_v18 = vpop.f32.mrb[0].mxu1 }
 0x1eb   :  { %v232_v19 = vadd.f32 %v974_v17, %v231_v18  ;;  %v1186_v20 = vpop.f32.mrb[1].mxu1  ;;  %v463_v17 = vld [vmem:[#allocation2 + $0x1d0] sm:$0xff]  ;;  %v464_v18 = vld [vmem:[#allocation2 + $0x1d8] sm:$0xff] }
 0x1ec   :  { %v465_v20 = vld [vmem:[#allocation2 + $0x1e0] sm:$0xff] }
 0x1ed   :  { %v235_v21 = vmul.f32 %v232_v19, %v232_v19 }
 0x1ef   :  { %v236_v22 = vmul.f32 %v235_v21, %v232_v19  ;;  %v466_v21 = vld [vmem:[#allocation2 + $0x1e8] sm:$0xff] }
 0x1f1   :  { %v237_v23 = vmul.f32 0.044715, %v236_v22  ;;  %v1536_v22 = vpack.c.bf16 %v466_v21, %v465_v20  ;;  %v663_v21 = vld [vmem:[#allocation2 + $0x2d0] sm:$0xff] }
 0x1f3   :  { %v238_v24 = vadd.f32 %v237_v23, %v232_v19  ;;  %v467_v23 = vld [vmem:[#allocation2 + $0x1f0] sm:$0xff] }
 0x1f5   :  { %v239_v25 = vmul.f32 0.7978846, %v238_v24  ;;  %v468_v24 = vld [vmem:[#allocation2 + $0x1f8] sm:$0xff] }
 0x1f7   :  { %1647 = vtanh.f32 %v239_v25  ;;  %v1539_v25 = vpack.c.bf16 %v468_v24, %v467_v23  ;;  %v665_v24 = vld [vmem:[#allocation2 + $0x2e0] sm:$0xff] }
 0x201   :  { %v1648_v26 = vpop.eup %1647 }
 0x202   :  { %v241_v27 = vadd.f32 1.0, %v1648_v26  ;;  %v549_v26 = vld [vmem:[#allocation2 + $0x200] sm:$0xff] }
 0x204   :  { %v242_v28 = vmul.f32 0.5, %v241_v27  ;;  %v550_v27 = vld [vmem:[#allocation2 + $0x208] sm:$0xff] }
 0x206   :  { %v243_v29 = vmul.f32 %v242_v28, %v232_v19  ;;  %v1533_v19 = vpack.c.bf16 %v464_v18, %v463_v17  ;;  %v551_v28 = vld [vmem:[#allocation2 + $0x210] sm:$0xff]  ;;  %v661_v18 = vld [vmem:[#allocation2 + $0x2c0] sm:$0xff] }
 0x207   :  { %v1545_v31 = vpack.c.bf16 %v552_v30, %v551_v28  ;;  %v668_v28 = vld [vmem:[#allocation2 + $0x2f8] sm:$0xff]  ;;  %v757_v30 = vld [vmem:[#allocation2 + $0x300] sm:$0xff] }
 0x208   :  { %1220 = vmatmul.mubr.f32.vlgmr.msra.gmra.mrb[2].mxu0 %v243_v29  ;;  %v1542_v29 = vpack.c.bf16 %v550_v27, %v549_v26  ;;  %v667_v27 = vld [vmem:[#allocation2 + $0x2f0] sm:$0xff] }
 0x209   :  { %1289 = vmatprep.mubr.msk.f32.mxu0 %vm1711_vm0, %v1712_v1  ;;  %1519 = vmatpush3.bf16.msra.mxu0 %v1518_v53 }
 0x20a   :  { %1520 = vmatprep.subr.bf16.mxu0 %v1710_v0 }
 0x20d   :  { %1522 = vmatpush3.bf16.msra.mxu0 %v1521_v7 }
 0x20e   :  { %1523 = vmatprep.subr.bf16.mxu0 %v1710_v0 }
 0x211   :  { %1525 = vmatpush3.bf16.msra.mxu0 %v1524_v10  ;;  %v656_v10 = vld [vmem:[#allocation2 + $0x298] sm:$0xff] }
 0x212   :  { %1526 = vmatprep.subr.bf16.mxu0 %v1710_v0  ;;  %v1569_v11 = vpack.c.bf16 %v656_v10, %v655_v9 }
 0x215   :  { %1528 = vmatpush3.bf16.msra.mxu0 %v1527_v13  ;;  %v658_v13 = vld [vmem:[#allocation2 + $0x2a8] sm:$0xff] }
 0x216   :  { %1529 = vmatprep.subr.bf16.mxu0 %v1710_v0  ;;  %v1572_v14 = vpack.c.bf16 %v658_v13, %v657_v12 }
 0x219   :  { %1531 = vmatpush3.bf16.msra.mxu0 %v1530_v16  ;;  %v660_v16 = vld [vmem:[#allocation2 + $0x2b8] sm:$0xff] }
 0x21a   :  { %1532 = vmatprep.subr.bf16.mxu0 %v1710_v0  ;;  %v1575_v17 = vpack.c.bf16 %v660_v16, %v659_v15 }
 0x21d   :  { %1534 = vmatpush3.bf16.msra.mxu0 %v1533_v19  ;;  %v662_v19 = vld [vmem:[#allocation2 + $0x2c8] sm:$0xff] }
 0x21e   :  { %1535 = vmatprep.subr.bf16.mxu0 %v1710_v0  ;;  %v1578_v20 = vpack.c.bf16 %v662_v19, %v661_v18 }
 0x221   :  { %1537 = vmatpush3.bf16.msra.mxu0 %v1536_v22  ;;  %v664_v22 = vld [vmem:[#allocation2 + $0x2d8] sm:$0xff] }
 0x222   :  { %1538 = vmatprep.subr.bf16.mxu0 %v1710_v0  ;;  %v1581_v23 = vpack.c.bf16 %v664_v22, %v663_v21  ;;  %v863_v21 = vld [vmem:[%s1965_s3 + $0x18] sm:$0xff] }
 0x225   :  { %1540 = vmatpush3.bf16.msra.mxu0 %v1539_v25  ;;  %v666_v25 = vld [vmem:[#allocation2 + $0x2e8] sm:$0xff] }
 0x226   :  { %1565 = vmatprep.subr.bf16.mxu0 %v1710_v0  ;;  %v1584_v26 = vpack.c.bf16 %v666_v25, %v665_v24  ;;  %v865_v24 = vld [vmem:[%s1965_s3 + $0x28] sm:$0xff] }
 0x2db   :  { %v335_v55 = vpop.f32.mrb[2].mxu0 }
 0x2dc   :  { %v336_v56 = vadd.f32 %v976_v54, %v335_v55  ;;  %v1221_v57 = vpop.f32.mrb[3].mxu0 }
 0x2de   :  { %v339_v58 = vmul.f32 %v336_v56, %v336_v56 }
 0x2e0   :  { %v340_v59 = vmul.f32 %v339_v58, %v336_v56 }
 0x2e2   :  { %v341_v60 = vmul.f32 0.044715, %v340_v59 }
 0x2e4   :  { %v342_v61 = vadd.f32 %v341_v60, %v336_v56  ;;  %v563_v60 = vld [vmem:[#allocation2 + $0x270] sm:$0xff] }
 0x2e6   :  { %v343_v62 = vmul.f32 0.7978846, %v342_v61  ;;  %v564_v61 = vld [vmem:[#allocation2 + $0x278] sm:$0xff] }
 0x2e8   :  { %1649 = vtanh.f32 %v343_v62  ;;  %v1563_v62 = vpack.c.bf16 %v564_v61, %v563_v60  ;;  %v769_v60 = vld [vmem:[#allocation2 + $0x360] sm:$0xff]  ;;  %v770_v61 = vld [vmem:[#allocation2 + $0x368] sm:$0xff] }
 0x2f2   :  { %v1650_v63 = vpop.eup %1649 }
 0x2f3   :  { %v345_v2 = vadd.f32 1.0, %v1650_v63  ;;  %v653_v63 = vld [vmem:[#allocation2 + $0x280] sm:$0xff] }
 0x2f5   :  { %v346_v3 = vmul.f32 0.5, %v345_v2  ;;  %v654_v2 = vld [vmem:[#allocation2 + $0x288] sm:$0xff] }
 0x2f7   :  { %v347_v4 = vmul.f32 %v346_v3, %v336_v56  ;;  %v1566_v3 = vpack.c.bf16 %v654_v2, %v653_v63  ;;  %v771_v63 = vld [vmem:[#allocation2 + $0x370] sm:$0xff]  ;;  %v772_v2 = vld [vmem:[#allocation2 + $0x378] sm:$0xff] }
 0x2f9   :  { %1255 = vmatmul.mubr.f32.vlgmr.msra.gmra.mrb[2].mxu1 %v347_v4  ;;  %v980_v4 = vld [vmem:[%s1966_s4 + $0x4] ss:$0 sm:$0xff] }
 0x2fa   :  { %1324 = vmatprep.mubr.msk.f32.mxu1 %vm1711_vm0, %v1712_v1  ;;  %1543 = vmatpush3.bf16.msra.mxu1 %v1542_v29  ;;  %v1587_v29 = vpack.c.bf16 %v668_v28, %v667_v27  ;;  %v867_v27 = vld [vmem:[%s1965_s3 + $0x38] sm:$0xff] }
 0x2fb   :  { %1544 = vmatprep.subr.bf16.mxu1 %v1710_v0 }
 0x2fe   :  { %1546 = vmatpush3.bf16.msra.mxu1 %v1545_v31  ;;  %v758_v31 = vld [vmem:[#allocation2 + $0x308] sm:$0xff] }
 0x2ff   :  { %1547 = vmatprep.subr.bf16.mxu1 %v1710_v0  ;;  %v1590_v32 = vpack.c.bf16 %v758_v31, %v757_v30  ;;  %v869_v30 = vld [vmem:[%s1965_s3 + $0x48] sm:$0xff] }
 0x302   :  { %1549 = vmatpush3.bf16.msra.mxu1 %v1548_v34 }
 0x303   :  { %1550 = vmatprep.subr.bf16.mxu1 %v1710_v0 }
 0x306   :  { %1552 = vmatpush3.bf16.msra.mxu1 %v1551_v37 }
 0x307   :  { %1553 = vmatprep.subr.bf16.mxu1 %v1710_v0 }
 0x30a   :  { %1555 = vmatpush3.bf16.msra.mxu1 %v1554_v40 }
 0x30b   :  { %1556 = vmatprep.subr.bf16.mxu1 %v1710_v0 }
 0x30e   :  { %1558 = vmatpush3.bf16.msra.mxu1 %v1557_v43 }
 0x30f   :  { %1559 = vmatprep.subr.bf16.mxu1 %v1710_v0 }
 0x312   :  { %1561 = vmatpush3.bf16.msra.mxu1 %v1560_v46  ;;  %v759_v46 = vld [vmem:[#allocation2 + $0x310] sm:$0xff] }
 0x313   :  { %1562 = vmatprep.subr.bf16.mxu1 %v1710_v0 }
 0x316   :  { %1564 = vmatpush3.bf16.msra.mxu1 %v1563_v62  ;;  %v1608_v62 = vpack.c.bf16 %v770_v61, %v769_v60 }
 0x317   :  { %1589 = vmatprep.subr.bf16.mxu1 %v1710_v0 }
 0x3cc   :  { %v439_v48 = vpop.f32.mrb[2].mxu1 }
 0x3cd   :  { %v440_v49 = vadd.f32 %v978_v47, %v439_v48  ;;  %v1256_v50 = vpop.f32.mrb[3].mxu1  ;;  %v760_v47 = vld [vmem:[#allocation2 + $0x318] sm:$0xff] }
 0x3ce   :  { %v1593_v48 = vpack.c.bf16 %v760_v47, %v759_v46  ;;  %v762_v50 = vld [vmem:[#allocation2 + $0x328] sm:$0xff] }
 0x3cf   :  { %v443_v51 = vmul.f32 %v440_v49, %v440_v49 }
 0x3d1   :  { %v444_v52 = vmul.f32 %v443_v51, %v440_v49 }
 0x3d3   :  { %v445_v53 = vmul.f32 0.044715, %v444_v52  ;;  %v763_v52 = vld [vmem:[#allocation2 + $0x330] sm:$0xff] }
 0x3d5   :  { %v446_v54 = vadd.f32 %v445_v53, %v440_v49  ;;  %v764_v53 = vld [vmem:[#allocation2 + $0x338] sm:$0xff] }
 0x3d7   :  { %v447_v55 = vmul.f32 0.7978846, %v446_v54  ;;  %v1599_v54 = vpack.c.bf16 %v764_v53, %v763_v52 }
 0x3d9   :  { %1651 = vtanh.f32 %v447_v55  ;;  %v765_v55 = vld [vmem:[#allocation2 + $0x340] sm:$0xff] }
 0x3e3   :  { %v1652_v56 = vpop.eup %1651 }
 0x3e4   :  { %v449_v57 = vadd.f32 1.0, %v1652_v56 }
 0x3e6   :  { %v450_v58 = vmul.f32 0.5, %v449_v57  ;;  %v767_v57 = vld [vmem:[#allocation2 + $0x350] sm:$0xff] }
 0x3e8   :  { %v451_v59 = vmul.f32 %v450_v58, %v440_v49  ;;  %v761_v49 = vld [vmem:[#allocation2 + $0x320] sm:$0xff]  ;;  %v768_v58 = vld [vmem:[#allocation2 + $0x358] sm:$0xff] }
 0x3e9   :  { %v1596_v51 = vpack.c.bf16 %v762_v50, %v761_v49 }
 0x3ea   :  { %1290 = vmatmul.mubr.f32.vlgmr.msra.gmra.mrb[4].mxu0 %v451_v59  ;;  %v1605_v59 = vpack.c.bf16 %v768_v58, %v767_v57 }
 0x3eb   :  { %1359 = vmatprep.mubr.msk.f32.mxu0 %vm1711_vm0, %v1712_v1  ;;  %1567 = vmatpush3.bf16.msra.mxu0 %v1566_v3  ;;  %v1611_v3 = vpack.c.bf16 %v772_v2, %v771_v63 }
 0x3ec   :  { %1568 = vmatprep.subr.bf16.mxu0 %v1710_v0 }
 0x3ef   :  { %1570 = vmatpush3.bf16.msra.mxu0 %v1569_v11 }
 0x3f0   :  { %1571 = vmatprep.subr.bf16.mxu0 %v1710_v0 }
 0x3f3   :  { %1573 = vmatpush3.bf16.msra.mxu0 %v1572_v14 }
 0x3f4   :  { %1574 = vmatprep.subr.bf16.mxu0 %v1710_v0 }
 0x3f7   :  { %1576 = vmatpush3.bf16.msra.mxu0 %v1575_v17 }
 0x3f8   :  { %1577 = vmatprep.subr.bf16.mxu0 %v1710_v0 }
 0x3fb   :  { %1579 = vmatpush3.bf16.msra.mxu0 %v1578_v20  ;;  %v862_v20 = vld [vmem:[%s1965_s3 + $0x10] sm:$0xff] }
 0x3fc   :  { %1580 = vmatprep.subr.bf16.mxu0 %v1710_v0  ;;  %v1617_v22 = vpack.c.bf16 %v863_v21, %v862_v20 }
 0x3ff   :  { %1582 = vmatpush3.bf16.msra.mxu0 %v1581_v23  ;;  %v864_v23 = vld [vmem:[%s1965_s3 + $0x20] sm:$0xff] }
 0x400   :  { %1583 = vmatprep.subr.bf16.mxu0 %v1710_v0  ;;  %v1620_v25 = vpack.c.bf16 %v865_v24, %v864_v23 }
 0x403   :  { %1585 = vmatpush3.bf16.msra.mxu0 %v1584_v26  ;;  %v866_v26 = vld [vmem:[%s1965_s3 + $0x30] sm:$0xff] }
 0x404   :  { %1586 = vmatprep.subr.bf16.mxu0 %v1710_v0  ;;  %v1623_v28 = vpack.c.bf16 %v867_v27, %v866_v26 }
 0x407   :  { %1588 = vmatpush3.bf16.msra.mxu0 %v1587_v29  ;;  %v868_v29 = vld [vmem:[%s1965_s3 + $0x40] sm:$0xff] }
 0x408   :  { %1613 = vmatprep.subr.bf16.mxu0 %v1710_v0  ;;  %v1626_v31 = vpack.c.bf16 %v869_v30, %v868_v29 }
 0x4bd   :  { %v543_v5 = vpop.f32.mrb[4].mxu0 }
 0x4be   :  { %v544_v6 = vadd.f32 %v980_v4, %v543_v5  ;;  %v1291_v7 = vpop.f32.mrb[5].mxu0  ;;  %v860_v4 = vld [vmem:[%s1965_s3] sm:$0xff]  ;;  %v861_v5 = vld [vmem:[%s1965_s3 + $0x8] sm:$0xff] }
 0x4bf   :  { %v984_v7 = vld [vmem:[%s1966_s4 + $0x6] ss:$0 sm:$0xff] }
 0x4c0   :  { %v547_v8 = vmax.f32 %v544_v6, 0.0  ;;  %v1614_v6 = vpack.c.bf16 %v861_v5, %v860_v4 }
 0x4c2   :  { %1325 = vmatmul.mubr.f32.vlgmr.msra.gmra.mrb[4].mxu1 %v547_v8 }
 0x4c3   :  { %1394 = vmatprep.mubr.msk.f32.mxu1 %vm1711_vm0, %v1712_v1  ;;  %1591 = vmatpush3.bf16.msra.mxu1 %v1590_v32  ;;  %v870_v32 = vld [vmem:[%s1965_s3 + $0x50] sm:$0xff] }
 0x4c4   :  { %1592 = vmatprep.subr.bf16.mxu1 %v1710_v0 }
 0x4c7   :  { %1594 = vmatpush3.bf16.msra.mxu1 %v1593_v48 }
 0x4c8   :  { %1595 = vmatprep.subr.bf16.mxu1 %v1710_v0 }
 0x4cb   :  { %1597 = vmatpush3.bf16.msra.mxu1 %v1596_v51 }
 0x4cc   :  { %1598 = vmatprep.subr.bf16.mxu1 %v1710_v0 }
 0x4cf   :  { %1600 = vmatpush3.bf16.msra.mxu1 %v1599_v54 }
 0x4d0   :  { %1601 = vmatprep.subr.bf16.mxu1 %v1710_v0 }
 0x595   :  { %v639_v34 = vpop.f32.mrb[4].mxu1 }
 0x596   :  { %v640_v35 = vadd.f32 %v982_v33, %v639_v34  ;;  %v1326_v36 = vpop.f32.mrb[5].mxu1  ;;  %v871_v33 = vld [vmem:[%s1965_s3 + $0x58] sm:$0xff] }
 0x597   :  { %v1629_v34 = vpack.c.bf16 %v871_v33, %v870_v32  ;;  %v873_v36 = vld [vmem:[%s1965_s3 + $0x68] sm:$0xff] }
 0x598   :  { %v643_v37 = vmul.f32 %v640_v35, %v640_v35 }
 0x59a   :  { %v644_v38 = vmul.f32 %v643_v37, %v640_v35 }
 0x59c   :  { %v645_v39 = vmul.f32 0.044715, %v644_v38  ;;  %v874_v38 = vld [vmem:[%s1965_s3 + $0x70] sm:$0xff] }
 0x59e   :  { %v646_v40 = vadd.f32 %v645_v39, %v640_v35  ;;  %v875_v39 = vld [vmem:[%s1965_s3 + $0x78] sm:$0xff] }
 0x5a0   :  { %v647_v41 = vmul.f32 0.7978846, %v646_v40  ;;  %v1635_v40 = vpack.c.bf16 %v875_v39, %v874_v38 }
 0x5a2   :  { %1653 = vtanh.f32 %v647_v41  ;;  %v986_v41 = vld [vmem:[%s1966_s4 + $0x7] ss:$0 sm:$0xff]  ;;  %s961_s4 = sshll.u32 %s1714_s23, 4  ;;  %s962_s4 = int_to_ptr.vmem [resolvable:$true] %s961_s4 }
 0x5a3   :  { %s1681_s24 = scalar_lea.vmem %s962_s4, 128  ;;  %p1686_p9 = scmp.lt.s32.totalorder %s962_s4, %s962_s4 }
 0x5a4   :  { %p1682_p8 = scmp.ne.s32.totalorder %s962_s4, %s1681_s24  ;;  %p1687_p10 = scmp.lt.s32.totalorder %s1681_s24, %s1681_s24 }
 0x5a6   :  { %p1688_p11 = por %p1687_p10, %p1686_p9 }
 0x5a8   :  { %p1689_p12 = pnand %p1688_p11, %p1682_p8 }
 0x5ac   :  { %v1654_v42 = vpop.eup %1653 }
 0x5ad   :  { %v649_v43 = vadd.f32 1.0, %v1654_v42 }
 0x5af   :  { %v650_v44 = vmul.f32 0.5, %v649_v43 }
 0x5b1   :  { %v651_v45 = vmul.f32 %v650_v44, %v640_v35  ;;  %v872_v35 = vld [vmem:[%s1965_s3 + $0x60] sm:$0xff] }
 0x5b2   :  { %v1632_v37 = vpack.c.bf16 %v873_v36, %v872_v35 }
 0x5b3   :  { %1360 = vmatmul.mubr.f32.vlgmr.msra.gmra.mrb[6].mxu0 %v651_v45 }
 0x5b4   :  { %1429 = vmatprep.mubr.msk.f32.mxu0 %vm1711_vm0, %v1712_v1  ;;  %v766_v1 = vld [vmem:[#allocation2 + $0x348] sm:$0xff]  ;;  %1615 = vmatpush3.bf16.msra.mxu0 %v1614_v6 }
 0x5b5   :  { %v1602_v56 = vpack.c.bf16 %v766_v1, %v765_v55  ;;  %1616 = vmatprep.subr.bf16.mxu0 %v1710_v0 }
 0x5b7   :  { %1603 = vmatpush3.bf16.msra.mxu1 %v1602_v56 }
 0x5b8   :  { %1604 = vmatprep.subr.bf16.mxu1 %v1710_v0  ;;  %1618 = vmatpush3.bf16.msra.mxu0 %v1617_v22 }
 0x5b9   :  { %1619 = vmatprep.subr.bf16.mxu0 %v1710_v0 }
 0x5bb   :  { %1606 = vmatpush3.bf16.msra.mxu1 %v1605_v59 }
 0x5bc   :  { %1607 = vmatprep.subr.bf16.mxu1 %v1710_v0  ;;  %1621 = vmatpush3.bf16.msra.mxu0 %v1620_v25 }
 0x5bd   :  { %1622 = vmatprep.subr.bf16.mxu0 %v1710_v0 }
 0x5bf   :  { %1609 = vmatpush3.bf16.msra.mxu1 %v1608_v62 }
 0x5c0   :  { %1610 = vmatprep.subr.bf16.mxu1 %v1710_v0  ;;  %1624 = vmatpush3.bf16.msra.mxu0 %v1623_v28 }
 0x5c1   :  { %1625 = vmatprep.subr.bf16.mxu0 %v1710_v0 }
 0x5c3   :  { %1612 = vmatpush3.bf16.msra.mxu1 %v1611_v3 }
 0x5c4   :  { %1627 = vmatpush3.bf16.msra.mxu0 %v1626_v31 }
 0x5c5   :  { %1628 = vmatprep.subr.bf16.mxu0 %v1710_v0 }
 0x5c8   :  { %1630 = vmatpush3.bf16.msra.mxu0 %v1629_v34 }
 0x5c9   :  { %1631 = vmatprep.subr.bf16.mxu0 %v1710_v0 }
 0x5cc   :  { %1633 = vmatpush3.bf16.msra.mxu0 %v1632_v37 }
 0x5cd   :  { %1634 = vmatprep.subr.bf16.mxu0 %v1710_v0  ;;  %v987_v0 = vld [vmem:[%s1967_s5] ss:$0 sm:$0xff] }
 0x5d0   :  { %1636 = vmatpush3.bf16.msra.mxu0 %v1635_v40 }
 0x686   :  { %v743_v8 = vpop.f32.mrb[6].mxu0 }
 0x687   :  { %v744_v9 = vadd.f32 %v984_v7, %v743_v8  ;;  %v1361_v10 = vpop.f32.mrb[7].mxu0 }
 0x689   :  { %v747_v11 = vmul.f32 %v744_v9, %v744_v9 }
 0x68b   :  { %v748_v12 = vmul.f32 %v747_v11, %v744_v9 }
 0x68d   :  { %v749_v13 = vmul.f32 0.044715, %v748_v12 }
 0x68f   :  { %v750_v14 = vadd.f32 %v749_v13, %v744_v9 }
 0x691   :  { %v751_v15 = vmul.f32 0.7978846, %v750_v14 }
 0x693   :  { %1655 = vtanh.f32 %v751_v15 }
 0x69d   :  { %v1656_v16 = vpop.eup %1655 }
 0x69e   :  { %v753_v17 = vadd.f32 1.0, %v1656_v16 }
 0x6a0   :  { %v754_v18 = vmul.f32 0.5, %v753_v17 }
 0x6a2   :  { %v755_v19 = vmul.f32 %v754_v18, %v744_v9 }
 0x6a4   :  { %1395 = vmatmul.mubr.f32.vlgmr.msra.gmra.mrb[6].mxu1 %v755_v19 }
 0x777   :  { %v847_v42 = vpop.f32.mrb[6].mxu1 }
 0x778   :  { %v848_v43 = vadd.f32 %v986_v41, %v847_v42  ;;  %v1396_v44 = vpop.f32.mrb[7].mxu1 }
 0x77a   :  { %v851_v45 = vmul.f32 %v848_v43, %v848_v43 }
 0x77c   :  { %v852_v46 = vmul.f32 %v851_v45, %v848_v43 }
 0x77e   :  { %v853_v47 = vmul.f32 0.044715, %v852_v46 }
 0x780   :  { %v854_v48 = vadd.f32 %v853_v47, %v848_v43 }
 0x782   :  { %v855_v49 = vmul.f32 0.7978846, %v854_v48 }
 0x784   :  { %1657 = vtanh.f32 %v855_v49 }
 0x78e   :  { %v1658_v50 = vpop.eup %1657 }
 0x78f   :  { %v857_v51 = vadd.f32 1.0, %v1658_v50 }
 0x791   :  { %v858_v52 = vmul.f32 0.5, %v857_v51 }
 0x793   :  { %v859_v53 = vmul.f32 %v858_v52, %v848_v43 }
 0x795   :  { %1430 = vmatmul.mubr.f32.vlgmr.msra.gmra.mrb[8].mxu0 %v859_v53 }
 0x868   :  { %v949_v54 = vpop.f32.mrb[8].mxu0 }
 0x869   :  { %v950_v55 = vadd.f32 %v987_v0, %v949_v54  ;;  %v1431_v1 = vpop.f32.mrb[9].mxu0 }
 0x86b   :  { %954 = vst.msk [vmem:[#allocation5] sm:$0xff] %vm953_vm5, %v950_v55 }
 0x86c   :  { %1692 = shalt.err (!%p1689_p12)
}
 0x86d   :  { %s1693_s27 = scalar_lea.hbm %s1968_s6, 128 }
 0x86e   :  { %p1694_p13 = scmp.ne.s32.totalorder %s1968_s6, %s1693_s27  ;;  %p1697_p0 = scmp.lt.u32.totalorder %s1693_s27, %s1968_s6 }
 0x870   :  { %p1699_p1 = pnand %p1697_p0, %p1694_p13 }
 0x872   :  { %1702 = shalt.err (!%p1699_p1)
}
 0x873   :  { %964 = dma.vmem_to_hbm [thread:$0]  %s962_s4, 128, %s1968_s6, [#allocation4]  }
 0x874   :  { %1705 = dma.done.wait [#allocation4], 128  }
 0x875   :  { %1706 = vsyncadd [#allocation4], 4294967168 }
 0x876   :  { %968 = vsyncpa [#allocation3], 1 }
 0x877   :  { %969 = vsyncpa [#allocation4], 1 }

</bundles_post_ra>
